<compile_context>
chip_gen: v7x
topology: tpu7x:2x2x1
jax: 0.10.0
libtpu: 0.0.40
codegen_flags: <defaults>
</compile_context>

<pallas_src>
import jax
import jax.numpy as jnp
from jax.experimental import pallas as pl
from jax.experimental.pallas import tpu as pltpu


def _rbfn_kernel(x_ref, ct_ref, c2_ref, sig2_ref, w_ref, b_ref, out_ref):
    x = x_ref[...]                                   # (TN, D) f32
    ct = ct_ref[...]                                 # (D, C)  f32 (pre-transposed centres)

    # ||x - c||^2 = ||x||^2 + ||c||^2 - 2 x.c  (cross term on the MXU).
    x2 = jnp.sum(x * x, axis=-1, keepdims=True)                       # (TN, 1)
    xc = jnp.dot(x, ct, preferred_element_type=jnp.float32)           # (TN, C)
    sq_dist = jnp.maximum(x2 + c2_ref[...] - 2.0 * xc, 0.0)           # (TN, C)

    # gaussian basis: phi = exp(-(dist * sigma)^2) = exp(-sq_dist * sigma^2)
    phi = jnp.exp(-sq_dist * sig2_ref[...])                           # (TN, C)

    # Linear layer as VPU mul + lane reduction (no MXU for a 1-column output).
    acc = jnp.sum(phi * w_ref[...], axis=-1, keepdims=True)           # (TN, 1)

    # Lane-dense store: (1, TN) with the batch on the lane axis.
    b = b_ref[0, 0]                                                   # SMEM scalar
    out_ref[...] = (acc.T + b).astype(out_ref.dtype)                  # (1, TN)


def _pick_block_n(n):
    # Single block for small batches; otherwise a 128-multiple tile so the
    # lane-dense (1, TN) output block satisfies the (8, 128) constraint and the
    # x DMA pipelines against compute.
    for cand in (512, 256, 128):
        if n > cand and n % cand == 0:
            return cand
    return n


def rbfn_forward(x, centres, sigmas, lin_w, lin_b, *, block_n=None):
    """x: (N, D); centres: (C, D); sigmas: (C,); lin_w: (1, C); lin_b: (1,)."""
    N, D = x.shape
    C, _ = centres.shape

    x = x.astype(jnp.float32)
    c = centres.astype(jnp.float32)

    # Static-parameter prep (would be done once per model, not per call).
    ct = c.T                                                  # (D, C)
    c2 = jnp.sum(c * c, axis=-1).reshape(1, C)                # (1, C)  ||c||^2
    sig2 = (sigmas.astype(jnp.float32) ** 2).reshape(1, C)    # (1, C)  sigma^2
    w = lin_w.astype(jnp.float32).reshape(1, C)               # (1, C)
    b = lin_b.astype(jnp.float32).reshape(1, 1)               # (1, 1) -> SMEM scalar

    if block_n is None:
        block_n = _pick_block_n(N)
    grid = (N // block_n,)

    # NOTE(perf): at D=16, C=32 the MXU is <2% utilized; if C/D ever grow,
    # feed x/ct as bfloat16 (keep preferred_element_type=f32) on v6e/v7x.
    out_row = pl.pallas_call(
        _rbfn_kernel,
        out_shape=jax.ShapeDtypeStruct((1, N), jnp.float32),
        grid=grid,
        in_specs=[
            pl.BlockSpec((block_n, D), lambda i: (i, 0)),   # x: tiled over batch
            pl.BlockSpec((D, C), lambda i: (0, 0)),          # centres^T: resident
            pl.BlockSpec((1, C), lambda i: (0, 0)),          # ||c||^2: resident
            pl.BlockSpec((1, C), lambda i: (0, 0)),          # sigma^2: resident
            pl.BlockSpec((1, C), lambda i: (0, 0)),          # linear weight row
            pl.BlockSpec(memory_space=pltpu.MemorySpace.SMEM),  # bias scalar
        ],
        out_specs=pl.BlockSpec((1, block_n), lambda i: (0, i)),
        compiler_params=pltpu.CompilerParams(
            dimension_semantics=("parallel",)),
    )(x, ct, c2, sig2, w, b)

    return out_row.T                                          # (N, 1)


def rbfn_reference(x, centres, sigmas, lin_w, lin_b):
    # Pure-JAX reference following the PyTorch forward literally.
    diff = x[:, None, :] - centres[None, :, :]                # (N, C, D)
    distances = jnp.sqrt(jnp.sum(diff ** 2, axis=-1)) * sigmas[None, :]
    phi = jnp.exp(-(distances ** 2))
    return phi @ lin_w.T + lin_b[None, :]


if __name__ == "__main__":
    # Small shapes consistent with the module: batch N=8, input_shape D=16,
    # num_centers C=32.
    N, D, C = 8, 16, 32

    key = jax.random.PRNGKey(0)
    k_x, k_c, k_w, k_b = jax.random.split(key, 4)

    x = jax.random.normal(k_x, (N, D), dtype=jnp.float32)

    # Deterministic parameter init mirroring the module's __init__:
    #   centres ~ N(0, 1), sigmas = 1, linear layer params small random.
    centres = jax.random.normal(k_c, (C, D), dtype=jnp.float32)
    sigmas = jnp.ones((C,), dtype=jnp.float32)
    bound = 1.0 / jnp.sqrt(jnp.float32(C))
    lin_w = jax.random.uniform(k_w, (1, C), minval=-bound, maxval=bound,
                               dtype=jnp.float32)
    lin_b = jax.random.uniform(k_b, (1,), minval=-bound, maxval=bound,
                               dtype=jnp.float32)

    out = rbfn_forward(x, centres, sigmas, lin_w, lin_b)
    out = jax.block_until_ready(out)

    ref = rbfn_reference(x, centres, sigmas, lin_w, lin_b)
    assert out.shape == (N, 1), out.shape
    assert jnp.allclose(out, ref, atol=1e-4, rtol=1e-4), (
        f"max abs err = {jnp.max(jnp.abs(out - ref))}")

    print("KERNEL_OK")
</pallas_src>

<mosaic_0001>
module attributes {stable_mosaic.version = 11 : i64} {
  func.func @_rbfn_kernel(%arg0: i32, %arg1: memref<8x16xf32, #tpu.memory_space<vmem>>, %arg2: memref<16x32xf32, #tpu.memory_space<vmem>>, %arg3: memref<1x32xf32, #tpu.memory_space<vmem>>, %arg4: memref<1x32xf32, #tpu.memory_space<vmem>>, %arg5: memref<1x32xf32, #tpu.memory_space<vmem>>, %arg6: memref<1x1xf32, #tpu.memory_space<smem>>, %arg7: memref<1x8xf32, #tpu.memory_space<vmem>>) attributes {dimension_semantics = [#tpu.dimension_semantics<parallel>], iteration_bounds = array<i64: 1>, scalar_prefetch = 0 : i64, scratch_operands = 0 : i64, tpu.core_type = #tpu.core_type<tc>, window_params = [{transform_indices = @transform_0, window_bounds = array<i64: 8, 16>}, {pipeline_mode = #tpu.pipeline_mode<synchronous>, transform_indices = @transform_1, window_bounds = array<i64: 16, 32>}, {pipeline_mode = #tpu.pipeline_mode<synchronous>, transform_indices = @transform_2, window_bounds = array<i64: 1, 32>}, {pipeline_mode = #tpu.pipeline_mode<synchronous>, transform_indices = @transform_3, window_bounds = array<i64: 1, 32>}, {pipeline_mode = #tpu.pipeline_mode<synchronous>, transform_indices = @transform_4, window_bounds = array<i64: 1, 32>}, {transform_indices = @transform_5, window_bounds = array<i64: 1, 1>}, {transform_indices = @transform_6, window_bounds = array<i64: 1, 8>}]} {
    %c0 = arith.constant 0 : index
    %c0_0 = arith.constant 0 : index
    %0 = vector.load %arg1[%c0, %c0_0] : memref<8x16xf32, #tpu.memory_space<vmem>>, vector<8x16xf32>
    %c0_1 = arith.constant 0 : index
    %c0_2 = arith.constant 0 : index
    %1 = vector.load %arg2[%c0_1, %c0_2] : memref<16x32xf32, #tpu.memory_space<vmem>>, vector<16x32xf32>
    %2 = arith.mulf %0, %0 : vector<8x16xf32>
    %cst = arith.constant dense<0.000000e+00> : vector<8xf32>
    %3 = vector.multi_reduction <add>, %2, %cst [1] : vector<8x16xf32> to vector<8xf32>
    %4 = vector.shape_cast %3 : vector<8xf32> to vector<8x1xf32>
    %cst_3 = arith.constant dense<0.000000e+00> : vector<8x32xf32>
    %5 = tpu.matmul %0, %1, %cst_3 {dimension_numbers = #tpu.dot_dimension_numbers<[1], [0], [0], [1], [0, 0, 1, 1], [], []>} : vector<8x16xf32>, vector<16x32xf32>, vector<8x32xf32> -> vector<8x32xf32>
    %c0_4 = arith.constant 0 : index
    %c0_5 = arith.constant 0 : index
    %6 = vector.load %arg3[%c0_4, %c0_5] : memref<1x32xf32, #tpu.memory_space<vmem>>, vector<1x32xf32>
    %7 = vector.broadcast %4 : vector<8x1xf32> to vector<8x32xf32>
    %8 = vector.broadcast %6 : vector<1x32xf32> to vector<8x32xf32>
    %9 = arith.addf %7, %8 : vector<8x32xf32>
    %cst_6 = arith.constant 2.000000e+00 : f32
    %10 = vector.broadcast %cst_6 : f32 to vector<8x32xf32>
    %11 = arith.mulf %10, %5 : vector<8x32xf32>
    %12 = arith.subf %9, %11 : vector<8x32xf32>
    %cst_7 = arith.constant 0.000000e+00 : f32
    %13 = vector.broadcast %cst_7 : f32 to vector<8x32xf32>
    %14 = arith.maximumf %12, %13 : vector<8x32xf32>
    %cst_8 = arith.constant 0.000000e+00 : f32
    %15 = vector.broadcast %cst_8 : f32 to vector<8x32xf32>
    %16 = arith.subf %15, %14 : vector<8x32xf32>
    %c0_9 = arith.constant 0 : index
    %c0_10 = arith.constant 0 : index
    %17 = vector.load %arg4[%c0_9, %c0_10] : memref<1x32xf32, #tpu.memory_space<vmem>>, vector<1x32xf32>
    %18 = vector.broadcast %17 : vector<1x32xf32> to vector<8x32xf32>
    %19 = arith.mulf %16, %18 : vector<8x32xf32>
    %20 = math.exp %19 : vector<8x32xf32>
    %c0_11 = arith.constant 0 : index
    %c0_12 = arith.constant 0 : index
    %21 = vector.load %arg5[%c0_11, %c0_12] : memref<1x32xf32, #tpu.memory_space<vmem>>, vector<1x32xf32>
    %22 = vector.broadcast %21 : vector<1x32xf32> to vector<8x32xf32>
    %23 = arith.mulf %20, %22 : vector<8x32xf32>
    %cst_13 = arith.constant dense<0.000000e+00> : vector<8xf32>
    %24 = vector.multi_reduction <add>, %23, %cst_13 [1] : vector<8x32xf32> to vector<8xf32>
    %25 = vector.shape_cast %24 : vector<8xf32> to vector<8x1xf32>
    %c0_14 = arith.constant 0 : index
    %c0_15 = arith.constant 0 : index
    %26 = memref.load %arg6[%c0_14, %c0_15] : memref<1x1xf32, #tpu.memory_space<smem>>
    %27 = tpu.transpose %25, [1, 0] : vector<8x1xf32> -> vector<1x8xf32>
    %28 = vector.broadcast %26 : f32 to vector<1x8xf32>
    %29 = arith.addf %27, %28 : vector<1x8xf32>
    %c0_16 = arith.constant 0 : index
    %c0_17 = arith.constant 0 : index
    %30 = vector.load %arg7[%c0_16, %c0_17] : memref<1x8xf32, #tpu.memory_space<vmem>>, vector<1x8xf32>
    tpu.vector_store %arg7[%c0_16, %c0_17], %29 {strides = array<i32>} : memref<1x8xf32, #tpu.memory_space<vmem>>, vector<1x8xf32>,
    return
  }
  func.func @transform_0(%arg0: i32) -> (i32, i32) {
    %c0_i32 = arith.constant 0 : i32
    %c0_i32_0 = arith.constant 0 : i32
    return %arg0, %c0_i32 : i32, i32
  }
  func.func @transform_1(%arg0: i32) -> (i32, i32) {
    %c0_i32 = arith.constant 0 : i32
    %c0_i32_0 = arith.constant 0 : i32
    %c0_i32_1 = arith.constant 0 : i32
    return %c0_i32, %c0_i32_0 : i32, i32
  }
  func.func @transform_2(%arg0: i32) -> (i32, i32) {
    %c0_i32 = arith.constant 0 : i32
    %c0_i32_0 = arith.constant 0 : i32
    %c0_i32_1 = arith.constant 0 : i32
    return %c0_i32, %c0_i32_0 : i32, i32
  }
  func.func @transform_3(%arg0: i32) -> (i32, i32) {
    %c0_i32 = arith.constant 0 : i32
    %c0_i32_0 = arith.constant 0 : i32
    %c0_i32_1 = arith.constant 0 : i32
    return %c0_i32, %c0_i32_0 : i32, i32
  }
  func.func @transform_4(%arg0: i32) -> (i32, i32) {
    %c0_i32 = arith.constant 0 : i32
    %c0_i32_0 = arith.constant 0 : i32
    %c0_i32_1 = arith.constant 0 : i32
    return %c0_i32, %c0_i32_0 : i32, i32
  }
  func.func @transform_5(%arg0: i32) -> (i32, i32) {
    %c0_i32 = arith.constant 0 : i32
    %c0_i32_0 = arith.constant 0 : i32
    %c0_i32_1 = arith.constant 0 : i32
    return %c0_i32, %c0_i32_0 : i32, i32
  }
  func.func @transform_6(%arg0: i32) -> (i32, i32) {
    %c0_i32 = arith.constant 0 : i32
    %c0_i32_0 = arith.constant 0 : i32
    return %c0_i32, %arg0 : i32, i32
  }
}

</mosaic_0001>

<bundles_post_ra>
// kernel: tpu_custom_call.1
= control target key start
LH: loop header
LB: loop body
LE: loop exit
PB: predicated region body
PF: predicated region fallthrough
CT: control target
= control target key end

     0   :  { %12 = vsyncpa [#allocation4], 0  ;;  %s416_s0 = inlined_call_operand.hbm [shape: f32[8,16], index: 0, kind: input, shape index: {}]   ;;  %s417_s1 = inlined_call_operand.hbm [shape: f32[16,32], index: 1, kind: input, shape index: {}]   ;;  %s418_s2 = inlined_call_operand.vmem [shape: f32[1,32], index: 2, kind: input, shape index: {}]   ;;  %s419_s3 = inlined_call_operand.vmem [shape: f32[1,32], index: 3, kind: input, shape index: {}]   ;;  %s420_s4 = inlined_call_operand.vmem [shape: f32[1,32], index: 4, kind: input, shape index: {}]   ;;  %s421_s5 = inlined_call_operand.<no memory space> [shape: f32[1,1], index: 5, kind: input, shape index: {}]   ;;  %s422_s6 = inlined_call_operand.hbm [shape: f32[1,8], index: 6, kind: output, shape index: {}]  }
   0x1   :  { %13 = vsyncpa [#allocation7], 0 }
   0x2   :  { %14 = vsyncpa [#allocation5], 0  ;;  %s318_s21 = smov [#allocation3]   ;;  %s319_s23 = smov [#allocation6]  }
   0x3   :  { %s21_s22 = sshll.u32 %s318_s21, 4  ;;  %s30_s24 = sshll.u32 %s319_s23, 4  ;;  %s22_s22 = int_to_ptr.vmem [resolvable:$true] %s21_s22  ;;  %s361_s24 = int_to_ptr.vmem [resolvable:$true] %s30_s24 }
   0x4   :  { %s246_s27 = scalar_lea.hbm %s416_s0, 128 }
   0x5   :  { %p247_p0 = scmp.ne.s32.totalorder %s416_s0, %s246_s27  ;;  %p250_p1 = scmp.lt.u32.totalorder %s246_s27, %s416_s0 }
   0x7   :  { %p252_p2 = pnand %p250_p1, %p247_p0 }
   0x9   :  { %255 = shalt.err (!%p252_p2)
}
   0xa   :  { %s256_s8 = scalar_lea.vmem %s22_s22, 128  ;;  %p261_p4 = scmp.lt.s32.totalorder %s22_s22, %s22_s22 }
   0xb   :  { %p257_p3 = scmp.ne.s32.totalorder %s22_s22, %s256_s8  ;;  %p262_p5 = scmp.lt.s32.totalorder %s256_s8, %s256_s8 }
   0xd   :  { %p263_p6 = por %p262_p5, %p261_p4 }
   0xf   :  { %p264_p7 = pnand %p263_p6, %p257_p3 }
  0x11   :  { %267 = shalt.err (!%p264_p7)
}
  0x12   :  { %24 = dma.hbm_to_vmem [thread:$0]  %s416_s0, 128, %s22_s22, [#allocation4]  }
  0x13   :  { %s268_s13 = scalar_lea.hbm %s417_s1, 256 }
  0x14   :  { %p269_p8 = scmp.ne.s32.totalorder %s417_s1, %s268_s13  ;;  %p272_p9 = scmp.lt.u32.totalorder %s268_s13, %s417_s1 }
  0x16   :  { %p274_p10 = pnand %p272_p9, %p269_p8 }
  0x18   :  { %277 = shalt.err (!%p274_p10)
}
  0x19   :  { %s278_s18 = scalar_lea.vmem %s361_s24, 256  ;;  %p283_p12 = scmp.lt.s32.totalorder %s361_s24, %s361_s24 }
  0x1a   :  { %p279_p11 = scmp.ne.s32.totalorder %s361_s24, %s278_s18  ;;  %p284_p13 = scmp.lt.s32.totalorder %s278_s18, %s278_s18 }
  0x1c   :  { %p285_p0 = por %p284_p13, %p283_p12 }
  0x1e   :  { %p286_p1 = pnand %p285_p0, %p279_p11 }
  0x20   :  { %289 = shalt.err (!%p286_p1)
}
  0x21   :  { %s320_s0 = smov 128   ;;  %s321_s19 = smov 8  }
  0x22   :  { %36 = dma.hbm_to_vmem [thread:$0]  %s417_s1, 256, %s361_s24, [#allocation7], %s320_s0, %s320_s0, %s321_s19  }
  0x23   :  { %312 = dma.done.wait [#allocation4], 128  }
  0x24   :  { %313 = vsyncadd [#allocation4], 4294967168 }
  0x25   :  { %314 = dma.done.wait [#allocation7], 256  }
  0x26   :  { %315 = vsyncadd [#allocation7], 4294967040  ;;  %v322_v0 = vmov 0.0|0.0   ;;  %vm323_vm0 = vmmov 0   ;;  %v324_v1 = vmov 0.0   ;;  %v52_v2 = vld [vmem:[#allocation6] sm:$0xff]  ;;  %v199_v25 = vstv %s421_s5 }
  0x27   :  { %233 = vmatprep.subr.bf16.mxu0 %v322_v0  ;;  %230 = vmatprep.mubr.msk.f32.mxu0 %vm323_vm0, %v324_v1  ;;  %v53_v3 = vld [vmem:[#allocation6 + $0x8] sm:$0xff]  ;;  %v51_v4 = vld [vmem:[#allocation3] sm:$0xff]  ;;  %vm55_vm1 = vcmask 130048   ;;  %vm162_vm2 = vcmask 261120   ;;  %vm201_vm3 = vcmask 57344  }
  0x28   :  { %v234_v5 = vpack.c.bf16 %v53_v3, %v52_v2  ;;  %v54_v6 = vmul.f32 %v51_v4, %v51_v4  ;;  %v220_v8 = vld [vmem:[%s418_s2] ss:$0 sm:$0xff] }
  0x29   :  { %v221_v16 = vld [vmem:[%s419_s3] ss:$0 sm:$0xff]  ;;  %s325_s3 = smov [#allocation8]  }
  0x2a   :  { %235 = vmatpush3.bf16.msra.mxu0 %v234_v5  ;;  %v56_v7 = vsel %vm55_vm1, %v54_v6, 0.0  ;;  %v222_v20 = vld [vmem:[%s420_s4] ss:$0 sm:$0xff]  ;;  %s209_s28 = sshll.u32 %s325_s3, 4  ;;  %s210_s28 = int_to_ptr.vmem [resolvable:$true] %s209_s28 }
  0x2b   :  { %57 = vadd.xlane.f32.xlu0 %v56_v7  ;;  %s290_s29 = scalar_lea.vmem %s210_s28, 16  ;;  %s294_s4 = scalar_lea.vmem %s210_s28, 32 }
  0x2c   :  { %p291_p2 = scmp.ne.s32.totalorder %s210_s28, %s290_s29  ;;  %p295_p3 = scmp.lt.s32.totalorder %s210_s28, %s210_s28 }
  0x2d   :  { %231 = vmatmul.mubr.msk.f32.vlgmr.msra.gmra.mrb[0].mxu0 %vm55_vm1, %v51_v4  ;;  %p296_p4 = scmp.lt.s32.totalorder %s294_s4, %s290_s29 }
  0x2f   :  { %p297_p5 = por %p296_p4, %p295_p3 }
  0x31   :  { %p298_p6 = pnand %p297_p5, %p291_p2 }
  0xb8   :  { %v58_v9 = vpop.xlane.xlu0 %57 }
  0xb9   :  { %v139_v10 = vadd.f32 %v220_v8, %v58_v9 }
 0x100   :  { %v128_v11 = vpop.f32.mrb[0].mxu0 }
 0x101   :  { %v140_v12 = vmul.f32 2.0, %v128_v11  ;;  %v232_v13 = vpop.f32.mrb[1].mxu0 }
 0x103   :  { %v141_v14 = vsub.f32 %v139_v10, %v140_v12 }
 0x105   :  { %v142_v15 = vmax.f32 %v141_v14, 0.0 }
 0x107   :  { %v143_v17 = vsub.f32 0.0, %v142_v15 }
 0x109   :  { %v151_v18 = vmul.f32 %v221_v16, %v143_v17 }
 0x10b   :  { %v152_v19 = vmul.f32 1.442695, %v151_v18 }
 0x10d   :  { %244 = vpow2.f32 %v152_v19 }
 0x117   :  { %v245_v21 = vpop.eup %244 }
 0x118   :  { %v161_v22 = vmul.f32 %v245_v21, %v222_v20 }
 0x11a   :  { %v163_v23 = vsel %vm162_vm2, %v161_v22, 0.0 }
 0x11b   :  { %164 = vadd.xlane.f32.xlu0 %v163_v23 }
 0x1a8   :  { %v165_v24 = vpop.xlane.xlu0 %164 }
 0x1a9   :  { %167 = vxpose.xlu1.b32.start.end [1/1] (short) (narrow) %v165_v24, 8 }
 0x229   :  { %v183_v26 = vpop.trf.xlu1 }
 0x22a   :  { %v200_v27 = vadd.f32 %v199_v25, %v183_v26 }
 0x22c   :  { %202 = vst.msk [vmem:[#allocation8] sm:$0x1] %vm201_vm3, %v200_v27 }
 0x22d   :  { %301 = shalt.err (!%p298_p6)
}
 0x22e   :  { %s302_s8 = scalar_lea.hbm %s422_s6, 16 }
 0x22f   :  { %p303_p7 = scmp.ne.s32.totalorder %s422_s6, %s302_s8  ;;  %p306_p8 = scmp.lt.u32.totalorder %s302_s8, %s422_s6 }
 0x231   :  { %p308_p9 = pnand %p306_p8, %p303_p7 }
 0x233   :  { %311 = shalt.err (!%p308_p9)
}
 0x234   :  { %212 = dma.vmem_to_hbm [thread:$0]  %s210_s28, 16, %s422_s6, [#allocation5]  }
 0x235   :  { %316 = dma.done.wait [#allocation5], 16  }
 0x236   :  { %317 = vsyncadd [#allocation5], 4294967280 }
 0x237   :  { %216 = vsyncpa [#allocation4], 1 }
 0x238   :  { %217 = vsyncpa [#allocation7], 1 }
 0x239   :  { %218 = vsyncpa [#allocation5], 1 }

</bundles_post_ra>
